<compile_context>
chip_gen: v5e
topology: v5e:2x2
jax: 0.10.0
libtpu: 0.0.40
codegen_flags: <defaults>
</compile_context>

<pallas_src>
import jax
import jax.numpy as jnp
from jax.experimental import pallas as pl
from jax.experimental.pallas import tpu as pltpu


def _round_up(x, m):
    return (x + m - 1) // m * m


_DEFAULT_VMEM_BUDGET = 48 * 1024 * 1024  # safe on every generation (v7x = 64 MiB)


def _vmem_budget_bytes():
    """~3/4 of physical VMEM if queryable, else a v7x-safe default."""
    try:
        cap = int(pltpu.get_tpu_info().vmem_capacity_bytes)
        if cap > 0:
            return (cap * 3) // 4      # 48 MiB on v7x, 96 MiB on v5e/v6e
    except Exception:
        pass
    return _DEFAULT_VMEM_BUDGET


def _const_spec(block_shape, index_map):
    """BlockSpec for an operand whose block never changes: single-buffered."""
    try:
        return pl.BlockSpec(block_shape, index_map, pipeline_mode=pl.Buffered(1))
    except Exception:  # older jax without pipeline_mode / Buffered
        return pl.BlockSpec(block_shape, index_map)


# ----------------------------------------------------------------------------
# Kernels
# ----------------------------------------------------------------------------

def _moe_resident_kernel(feat_ref, mask_ref,
                         gw1_ref, gb1_ref, gw2_ref, gb2_ref,
                         eb2_ref, ew_ref, eb1_ref,
                         out_ref):
    """grid = (batch_tiles,). All expert weights are VMEM-resident."""
    feats = feat_ref[...].astype(jnp.float32)                   # [TB, V, Dp]
    mask = mask_ref[...]                                        # [TB, V] f32
    counts = jnp.maximum(jnp.sum(mask, axis=1, keepdims=True), 1.0)
    mean = jnp.sum(feats * mask[:, :, None], axis=1) / counts   # [TB, Dp] f32
    mean_bf = mean.astype(jnp.bfloat16)

    # Gate: Linear -> ReLU -> Linear -> Softmax (bf16 matmuls, f32 acc,
    # exact normalization).
    h = jnp.dot(mean_bf, gw1_ref[...], preferred_element_type=jnp.float32)
    h = jnp.maximum(h + gb1_ref[...], 0.0)
    logits = jnp.dot(h.astype(jnp.bfloat16), gw2_ref[...],
                     preferred_element_type=jnp.float32) + gb2_ref[...]
    logits = logits - jnp.max(logits, axis=-1, keepdims=True)
    p = jnp.exp(logits)
    p = p / jnp.sum(p, axis=-1, keepdims=True)                  # [TB, E] f32

    # Accumulator init = sum_e p_e * b2_e, done as one tiny matmul.
    acc = jnp.dot(p, eb2_ref[...], preferred_element_type=jnp.float32)

    num_experts = ew_ref.shape[0]
    for e in range(num_experts):          # static unroll; experts are resident
        w1 = ew_ref[e, 0]                 # [Dp, Dp] bf16
        w2 = ew_ref[e, 1]                 # [Dp, Dp] bf16
        b1 = eb1_ref[e]                   # [1, Dp]  f32
        h1 = jnp.maximum(
            jnp.dot(mean_bf, w1, preferred_element_type=jnp.float32) + b1, 0.0)
        ge = p[:, e:e + 1]                # [TB, 1] gate weight (static slice)
        # Apply the gate to the f32 accumulator AFTER the matmul (numerics).
        acc = acc + ge * jnp.dot(h1.astype(jnp.bfloat16), w2,
                                 preferred_element_type=jnp.float32)

    out_ref[...] = acc.astype(out_ref.dtype)


def _moe_stream_kernel(feat_ref, mask_ref,
                       gw1_ref, gb1_ref, gw2_ref, gb2_ref,
                       eb2_ref, ew_ref, eb1_ref,
                       out_ref,
                       mean_sc, expw_sc, acc_sc):
    """grid = (batch_tiles, experts). Expert weights streamed per grid step."""
    e = pl.program_id(1)
    n_e = pl.num_programs(1)

    # ---- once per batch tile (first expert step): masked mean + gate --------
    @pl.when(e == 0)
    def _init():
        feats = feat_ref[...].astype(jnp.float32)               # [TB, V, Dp]
        mask = mask_ref[...]                                    # [TB, V] f32
        counts = jnp.maximum(jnp.sum(mask, axis=1, keepdims=True), 1.0)
        mean = jnp.sum(feats * mask[:, :, None], axis=1) / counts
        mean_bf = mean.astype(jnp.bfloat16)
        mean_sc[...] = mean_bf                                  # bf16 scratch

        h = jnp.dot(mean_bf, gw1_ref[...], preferred_element_type=jnp.float32)
        h = jnp.maximum(h + gb1_ref[...], 0.0)
        logits = jnp.dot(h.astype(jnp.bfloat16), gw2_ref[...],
                         preferred_element_type=jnp.float32) + gb2_ref[...]
        logits = logits - jnp.max(logits, axis=-1, keepdims=True)
        p = jnp.exp(logits)
        p = p / jnp.sum(p, axis=-1, keepdims=True)
        expw_sc[...] = p                                        # [TB, E] f32
        # Accumulator init = sum_e p_e * b2_e.
        acc_sc[...] = jnp.dot(p, eb2_ref[...],
                              preferred_element_type=jnp.float32)

    # ---- per-expert contribution (expert e streamed by the pipeline) --------
    mean_bf = mean_sc[...]                                      # [TB, Dp] bf16
    w1 = ew_ref[0, 0]                                           # [Dp, Dp] bf16
    w2 = ew_ref[0, 1]                                           # [Dp, Dp] bf16
    b1 = eb1_ref[0]                                             # [1, Dp]  f32

    h1 = jnp.maximum(
        jnp.dot(mean_bf, w1, preferred_element_type=jnp.float32) + b1, 0.0)

    # Gate weight for this expert via static-shape one-hot (no dynamic lanes).
    lane = jax.lax.broadcasted_iota(jnp.int32, expw_sc.shape, 1)
    ge = jnp.sum(expw_sc[...] * (lane == e).astype(jnp.float32),
                 axis=-1, keepdims=True)                        # [TB, 1]

    # Gate applied to the f32 accumulator after the matmul (numerics).
    acc_sc[...] += ge * jnp.dot(h1.astype(jnp.bfloat16), w2,
                                preferred_element_type=jnp.float32)

    @pl.when(e == n_e - 1)
    def _write():
        out_ref[...] = acc_sc[...].astype(out_ref.dtype)


# ----------------------------------------------------------------------------
# Parameter preparation (hoisted out of the per-call wrapper)
# ----------------------------------------------------------------------------

def prepare_params(params, feature_dim, num_experts):
    """Pad + cast parameters ONCE (not per forward call)."""
    gw1, gb1, gw2, gb2, ew1, eb1, ew2, eb2 = params
    D, E = feature_dim, num_experts
    H = D // 2
    f32, bf16 = jnp.float32, jnp.bfloat16
    Dp = _round_up(max(D, 128), 128)
    Hp = _round_up(max(H, 128), 128)

    gw1_p = jnp.zeros((Dp, Hp), bf16).at[:D, :H].set(gw1.astype(bf16))
    gb1_p = jnp.zeros((1, Hp), f32).at[0, :H].set(gb1.astype(f32))
    gw2_p = jnp.zeros((Hp, E), bf16).at[:H, :].set(gw2.astype(bf16))
    gb2_p = gb2.reshape(1, E).astype(f32)

    # Expert W1/W2 packed along one axis -> one DMA per expert step.
    ew_p = jnp.zeros((E, 2, Dp, Dp), bf16)
    ew_p = ew_p.at[:, 0, :D, :D].set(ew1.astype(bf16))
    ew_p = ew_p.at[:, 1, :D, :D].set(ew2.astype(bf16))
    eb1_p = jnp.zeros((E, 1, Dp), f32).at[:, 0, :D].set(eb1.astype(f32))
    eb2_p = jnp.zeros((E, Dp), f32).at[:, :D].set(eb2.astype(f32))

    return dict(D=D, H=H, E=E, Dp=Dp, Hp=Hp,
                gw1=gw1_p, gb1=gb1_p, gw2=gw2_p, gb2=gb2_p,
                ew=ew_p, eb1=eb1_p, eb2=eb2_p)


# ----------------------------------------------------------------------------
# VMEM estimate + forward wrapper
# ----------------------------------------------------------------------------

def _estimate_vmem(TB, V, Dp, Hp, E, resident):
    Vl = _round_up(V, 128)
    El = _round_up(E, 128)
    Vs = _round_up(V, 8)
    feat = 2 * TB * Vs * Dp * 4                        # double-buffered features
    mask = 2 * TB * Vl * 4
    gate = Dp * Hp * 2 + Hp * 4 + Hp * El * 2 + El * 4   # Buffered(1) constants
    eb2 = _round_up(E, 8) * Dp * 4
    out = 2 * TB * Dp * 4
    if resident:
        experts = E * 2 * Dp * Dp * 2 + E * 8 * Dp * 4
        scratch = 0
    else:
        experts = 2 * (2 * Dp * Dp * 2 + 8 * Dp * 4)   # double-buffered 1 expert
        scratch = TB * Dp * 2 + TB * El * 4 + TB * Dp * 4
    work = 4 * TB * Dp * 4                             # in-kernel temporaries
    return feat + mask + gate + eb2 + out + experts + scratch + work


def moe_view_aggregator(features, view_mask, prepped, *,
                        target_batch_tile=256, force_stream=False):
    """features: [B, V, D] f32, view_mask: [B, V] bool -> [B, D] f32."""
    B, V, D = features.shape
    assert D == prepped["D"], "feature_dim mismatch with prepared params"
    E, Dp, Hp = prepped["E"], prepped["Dp"], prepped["Hp"]
    f32 = jnp.float32

    budget = _vmem_budget_bytes()

    # --- execution path: VMEM-resident experts if they fit in ~1/4 budget ----
    expert_bytes = E * 2 * Dp * Dp * 2 + 2 * E * 8 * Dp * 4
    resident = (not force_stream) and (expert_bytes <= budget // 4)

    # --- batch tile: large, VMEM-budgeted, megacore-friendly -----------------
    B8 = _round_up(B, 8)
    TB = max(8, min(target_batch_tile, B8))
    if B8 >= 16:                          # keep >= 2 tiles so both TCs get work
        TB = min(TB, _round_up((B8 + 1) // 2, 8))
    while TB > 8 and _estimate_vmem(TB, V, Dp, Hp, E, resident) > budget:
        TB = max(8, _round_up(TB // 2, 8))
    if resident and _estimate_vmem(TB, V, Dp, Hp, E, True) > budget:
        resident = False                  # experts too big even at TB=8
        while TB > 8 and _estimate_vmem(TB, V, Dp, Hp, E, False) > budget:
            TB = max(8, _round_up(TB // 2, 8))

    Bp = _round_up(B, TB)
    n_tiles = Bp // TB

    # --- per-call activation padding (parameters already padded) -------------
    feats_p = jnp.zeros((Bp, V, Dp), f32).at[:B, :, :D].set(features.astype(f32))
    mask_p = jnp.zeros((Bp, V), f32).at[:B, :].set(view_mask.astype(f32))

    # --- cost estimate (helps XLA schedule around the opaque custom call) ----
    gate_flops = 2 * Bp * (Dp * Hp + Hp * E)
    expert_flops = 4 * Bp * E * Dp * Dp
    weight_bytes = E * 2 * Dp * Dp * 2 * (1 if resident else n_tiles)
    bytes_accessed = Bp * V * Dp * 4 + Bp * Dp * 4 + weight_bytes + Dp * Hp * 2
    try:
        cost = pl.CostEstimate(flops=int(gate_flops + expert_flops),
                               transcendentals=int(Bp * E),
                               bytes_accessed=int(bytes_accessed))
    except Exception:
        cost = None

    if resident:
        grid = (n_tiles,)
        in_specs = [
            pl.BlockSpec((TB, V, Dp), lambda b: (b, 0, 0)),          # features
            pl.BlockSpec((TB, V), lambda b: (b, 0)),                 # view mask
            _const_spec((Dp, Hp), lambda b: (0, 0)),                 # gate W1
            _const_spec((1, Hp), lambda b: (0, 0)),                  # gate b1
            _const_spec((Hp, E), lambda b: (0, 0)),                  # gate W2
            _const_spec((1, E), lambda b: (0, 0)),                   # gate b2
            _const_spec((E, Dp), lambda b: (0, 0)),                  # expert b2
            _const_spec((E, 2, Dp, Dp), lambda b: (0, 0, 0, 0)),     # expert W (resident)
            _const_spec((E, 1, Dp), lambda b: (0, 0, 0)),            # expert b1 (resident)
        ]
        out_specs = pl.BlockSpec((TB, Dp), lambda b: (b, 0))
        scratch_shapes = []
        kernel = _moe_resident_kernel
        dim_sem = ("parallel",)
    else:
        grid = (n_tiles, E)
        in_specs = [
            pl.BlockSpec((TB, V, Dp), lambda b, e: (b, 0, 0)),       # features
            pl.BlockSpec((TB, V), lambda b, e: (b, 0)),              # view mask
            _const_spec((Dp, Hp), lambda b, e: (0, 0)),              # gate W1
            _const_spec((1, Hp), lambda b, e: (0, 0)),               # gate b1
            _const_spec((Hp, E), lambda b, e: (0, 0)),               # gate W2
            _const_spec((1, E), lambda b, e: (0, 0)),                # gate b2
            _const_spec((E, Dp), lambda b, e: (0, 0)),               # expert b2 (all)
            pl.BlockSpec((1, 2, Dp, Dp), lambda b, e: (e, 0, 0, 0)), # expert W1/W2 (streamed)
            pl.BlockSpec((1, 1, Dp), lambda b, e: (e, 0, 0)),        # expert b1 (streamed)
        ]
        out_specs = pl.BlockSpec((TB, Dp), lambda b, e: (b, 0))
        scratch_shapes = [
            pltpu.VMEM((TB, Dp), jnp.bfloat16),   # masked mean (bf16, persists)
            pltpu.VMEM((TB, E), jnp.float32),     # gate softmax weights
            pltpu.VMEM((TB, Dp), jnp.float32),    # f32 accumulator
        ]
        kernel = _moe_stream_kernel
        dim_sem = ("parallel", "arbitrary")

    out = pl.pallas_call(
        kernel,
        out_shape=jax.ShapeDtypeStruct((Bp, Dp), f32),
        grid_spec=pltpu.PrefetchScalarGridSpec(
            num_scalar_prefetch=0,
            grid=grid,
            in_specs=in_specs,
            out_specs=out_specs,
            scratch_shapes=scratch_shapes),
        compiler_params=pltpu.CompilerParams(
            dimension_semantics=dim_sem,
            vmem_limit_bytes=int(budget)),
        cost_estimate=cost,
    )(feats_p, mask_p, prepped["gw1"], prepped["gb1"], prepped["gw2"],
      prepped["gb2"], prepped["eb2"], prepped["ew"], prepped["eb1"])

    return out[:B, :D]


# ----------------------------------------------------------------------------
# Reference + test
# ----------------------------------------------------------------------------

def _reference(features, view_mask, params, *, num_experts):
    """Pure-JAX f32 reference replicating the PyTorch forward."""
    gw1, gb1, gw2, gb2, ew1, eb1, ew2, eb2 = params
    mask = view_mask.astype(jnp.float32)
    masked = features * mask[:, :, None]
    counts = jnp.maximum(jnp.sum(mask, axis=1, keepdims=True), 1.0)
    mean = jnp.sum(masked, axis=1) / counts
    h = jax.nn.relu(mean @ gw1 + gb1)
    w = jax.nn.softmax(h @ gw2 + gb2, axis=-1)
    outs = []
    for e in range(num_experts):
        o = jax.nn.relu(mean @ ew1[e] + eb1[e]) @ ew2[e] + eb2[e]
        outs.append(o)
    stack = jnp.stack(outs, axis=2)            # [B, D, E]
    return jnp.sum(stack * w[:, None, :], axis=2)


def _init_params(key, feature_dim, num_experts):
    D, H, E = feature_dim, feature_dim // 2, num_experts
    ks = jax.random.split(key, 8)
    scale = 0.1
    gw1 = scale * jax.random.normal(ks[0], (D, H), jnp.float32)
    gb1 = scale * jax.random.normal(ks[1], (H,), jnp.float32)
    gw2 = scale * jax.random.normal(ks[2], (H, E), jnp.float32)
    gb2 = scale * jax.random.normal(ks[3], (E,), jnp.float32)
    ew1 = scale * jax.random.normal(ks[4], (E, D, D), jnp.float32)
    eb1 = scale * jax.random.normal(ks[5], (E, D), jnp.float32)
    ew2 = scale * jax.random.normal(ks[6], (E, D, D), jnp.float32)
    eb2 = scale * jax.random.normal(ks[7], (E, D), jnp.float32)
    return (gw1, gb1, gw2, gb2, ew1, eb1, ew2, eb2)


if __name__ == "__main__":
    B, V, D, E = 2, 8, 32, 2

    key = jax.random.PRNGKey(0)
    k_feat, k_mask, k_param = jax.random.split(key, 3)

    features = jax.random.normal(k_feat, (B, V, D), jnp.float32)
    # Deterministic boolean mask with at least one valid view per row.
    view_mask = jax.random.uniform(k_mask, (B, V)) > 0.4
    view_mask = view_mask.at[:, 0].set(True)

    params = _init_params(k_param, D, E)
    prepped = prepare_params(params, D, E)          # one-time padding / casting

    ref = _reference(features, view_mask, params, num_experts=E)

    # Resident-experts path (default for small E * D^2).
    out_res = moe_view_aggregator(features, view_mask, prepped)
    out_res = jax.block_until_ready(out_res)
    assert out_res.shape == (B, D)
    assert jnp.allclose(out_res, ref, atol=2e-2, rtol=2e-2), "resident mismatch"

    # Streaming path (exercised here via force_stream for validation).
    out_str = moe_view_aggregator(features, view_mask, prepped, force_stream=True)
    out_str = jax.block_until_ready(out_str)
    assert out_str.shape == (B, D)
    assert jnp.allclose(out_str, ref, atol=2e-2, rtol=2e-2), "streaming mismatch"

    print("KERNEL_OK")
</pallas_src>

<mosaic_0001>
module attributes {stable_mosaic.version = 11 : i64} {
  func.func @_moe_resident_kernel(%arg0: i32, %arg1: memref<8x8x128xf32, #tpu.memory_space<vmem>>, %arg2: memref<8x8xf32, #tpu.memory_space<vmem>>, %arg3: memref<128x128xbf16, #tpu.memory_space<vmem>>, %arg4: memref<1x128xf32, #tpu.memory_space<vmem>>, %arg5: memref<128x2xbf16, #tpu.memory_space<vmem>>, %arg6: memref<1x2xf32, #tpu.memory_space<vmem>>, %arg7: memref<2x128xf32, #tpu.memory_space<vmem>>, %arg8: memref<2x2x128x128xbf16, #tpu.memory_space<vmem>>, %arg9: memref<2x1x128xf32, #tpu.memory_space<vmem>>, %arg10: memref<8x128xf32, #tpu.memory_space<vmem>>) attributes {dimension_semantics = [#tpu.dimension_semantics<parallel>], iteration_bounds = array<i64: 1>, scalar_prefetch = 0 : i64, scratch_operands = 0 : i64, tpu.core_type = #tpu.core_type<tc>, window_params = [{transform_indices = @transform_0, window_bounds = array<i64: 8, 8, 128>}, {transform_indices = @transform_1, window_bounds = array<i64: 8, 8>}, {pipeline_mode = #tpu.pipeline_mode<synchronous>, transform_indices = @transform_2, window_bounds = array<i64: 128, 128>}, {pipeline_mode = #tpu.pipeline_mode<synchronous>, transform_indices = @transform_3, window_bounds = array<i64: 1, 128>}, {pipeline_mode = #tpu.pipeline_mode<synchronous>, transform_indices = @transform_4, window_bounds = array<i64: 128, 2>}, {pipeline_mode = #tpu.pipeline_mode<synchronous>, transform_indices = @transform_5, window_bounds = array<i64: 1, 2>}, {pipeline_mode = #tpu.pipeline_mode<synchronous>, transform_indices = @transform_6, window_bounds = array<i64: 2, 128>}, {pipeline_mode = #tpu.pipeline_mode<synchronous>, transform_indices = @transform_7, window_bounds = array<i64: 2, 2, 128, 128>}, {pipeline_mode = #tpu.pipeline_mode<synchronous>, transform_indices = @transform_8, window_bounds = array<i64: 2, 1, 128>}, {transform_indices = @transform_9, window_bounds = array<i64: 8, 128>}]} {
    %c0 = arith.constant 0 : index
    %c0_0 = arith.constant 0 : index
    %c0_1 = arith.constant 0 : index
    %0 = vector.load %arg1[%c0, %c0_0, %c0_1] : memref<8x8x128xf32, #tpu.memory_space<vmem>>, vector<8x8x128xf32>
    %c0_2 = arith.constant 0 : index
    %c0_3 = arith.constant 0 : index
    %1 = vector.load %arg2[%c0_2, %c0_3] : memref<8x8xf32, #tpu.memory_space<vmem>>, vector<8x8xf32>
    %cst = arith.constant dense<0.000000e+00> : vector<8xf32>
    %2 = vector.multi_reduction <add>, %1, %cst [1] : vector<8x8xf32> to vector<8xf32>
    %3 = vector.shape_cast %2 : vector<8xf32> to vector<8x1xf32>
    %cst_4 = arith.constant 1.000000e+00 : f32
    %4 = vector.broadcast %cst_4 : f32 to vector<8x1xf32>
    %5 = arith.maximumf %3, %4 : vector<8x1xf32>
    %6 = vector.shape_cast %1 : vector<8x8xf32> to vector<8x8x1xf32>
    %7 = vector.broadcast %6 : vector<8x8x1xf32> to vector<8x8x128xf32>
    %8 = arith.mulf %0, %7 : vector<8x8x128xf32>
    %cst_5 = arith.constant dense<0.000000e+00> : vector<8x128xf32>
    %9 = vector.multi_reduction <add>, %8, %cst_5 [1] : vector<8x8x128xf32> to vector<8x128xf32>
    %10 = vector.broadcast %5 : vector<8x1xf32> to vector<8x128xf32>
    %11 = arith.divf %9, %10 : vector<8x128xf32>
    %12 = arith.truncf %11 : vector<8x128xf32> to vector<8x128xbf16>
    %c0_6 = arith.constant 0 : index
    %c0_7 = arith.constant 0 : index
    %13 = vector.load %arg3[%c0_6, %c0_7] : memref<128x128xbf16, #tpu.memory_space<vmem>>, vector<128x128xbf16>
    %cst_8 = arith.constant dense<0.000000e+00> : vector<8x128xf32>
    %14 = tpu.matmul %12, %13, %cst_8 {dimension_numbers = #tpu.dot_dimension_numbers<[1], [0], [0], [1], [0, 0, 1, 1], [], []>} : vector<8x128xbf16>, vector<128x128xbf16>, vector<8x128xf32> -> vector<8x128xf32>
    %c0_9 = arith.constant 0 : index
    %c0_10 = arith.constant 0 : index
    %15 = vector.load %arg4[%c0_9, %c0_10] : memref<1x128xf32, #tpu.memory_space<vmem>>, vector<1x128xf32>
    %16 = vector.broadcast %15 : vector<1x128xf32> to vector<8x128xf32>
    %17 = arith.addf %14, %16 : vector<8x128xf32>
    %cst_11 = arith.constant 0.000000e+00 : f32
    %18 = vector.broadcast %cst_11 : f32 to vector<8x128xf32>
    %19 = arith.maximumf %17, %18 : vector<8x128xf32>
    %20 = arith.truncf %19 : vector<8x128xf32> to vector<8x128xbf16>
    %c0_12 = arith.constant 0 : index
    %c0_13 = arith.constant 0 : index
    %21 = vector.load %arg5[%c0_12, %c0_13] : memref<128x2xbf16, #tpu.memory_space<vmem>>, vector<128x2xbf16>
    %cst_14 = arith.constant dense<0.000000e+00> : vector<8x2xf32>
    %22 = tpu.matmul %20, %21, %cst_14 {dimension_numbers = #tpu.dot_dimension_numbers<[1], [0], [0], [1], [0, 0, 1, 1], [], []>} : vector<8x128xbf16>, vector<128x2xbf16>, vector<8x2xf32> -> vector<8x2xf32>
    %c0_15 = arith.constant 0 : index
    %c0_16 = arith.constant 0 : index
    %23 = vector.load %arg6[%c0_15, %c0_16] : memref<1x2xf32, #tpu.memory_space<vmem>>, vector<1x2xf32>
    %24 = vector.broadcast %23 : vector<1x2xf32> to vector<8x2xf32>
    %25 = arith.addf %22, %24 : vector<8x2xf32>
    %cst_17 = arith.constant dense<0xFF800000> : vector<8xf32>
    %26 = vector.multi_reduction <maximumf>, %25, %cst_17 [1] : vector<8x2xf32> to vector<8xf32>
    %27 = vector.shape_cast %26 : vector<8xf32> to vector<8x1xf32>
    %28 = vector.broadcast %27 : vector<8x1xf32> to vector<8x2xf32>
    %29 = arith.subf %25, %28 : vector<8x2xf32>
    %30 = math.exp %29 : vector<8x2xf32>
    %cst_18 = arith.constant dense<0.000000e+00> : vector<8xf32>
    %31 = vector.multi_reduction <add>, %30, %cst_18 [1] : vector<8x2xf32> to vector<8xf32>
    %32 = vector.shape_cast %31 : vector<8xf32> to vector<8x1xf32>
    %33 = vector.broadcast %32 : vector<8x1xf32> to vector<8x2xf32>
    %34 = arith.divf %30, %33 : vector<8x2xf32>
    %c0_19 = arith.constant 0 : index
    %c0_20 = arith.constant 0 : index
    %35 = vector.load %arg7[%c0_19, %c0_20] : memref<2x128xf32, #tpu.memory_space<vmem>>, vector<2x128xf32>
    %cst_21 = arith.constant dense<0.000000e+00> : vector<8x128xf32>
    %36 = tpu.matmul %34, %35, %cst_21 {dimension_numbers = #tpu.dot_dimension_numbers<[1], [0], [0], [1], [0, 0, 1, 1], [], []>} : vector<8x2xf32>, vector<2x128xf32>, vector<8x128xf32> -> vector<8x128xf32>
    %c0_22 = arith.constant 0 : index
    %c0_23 = arith.constant 0 : index
    %c0_24 = arith.constant 0 : index
    %c0_25 = arith.constant 0 : index
    %37 = vector.load %arg8[%c0_22, %c0_23, %c0_24, %c0_25] : memref<2x2x128x128xbf16, #tpu.memory_space<vmem>>, vector<1x1x128x128xbf16>
    %38 = vector.shape_cast %37 : vector<1x1x128x128xbf16> to vector<128x128xbf16>
    %c0_26 = arith.constant 0 : index
    %c1 = arith.constant 1 : index
    %c0_27 = arith.constant 0 : index
    %c0_28 = arith.constant 0 : index
    %39 = vector.load %arg8[%c0_26, %c1, %c0_27, %c0_28] : memref<2x2x128x128xbf16, #tpu.memory_space<vmem>>, vector<1x1x128x128xbf16>
    %40 = vector.shape_cast %39 : vector<1x1x128x128xbf16> to vector<128x128xbf16>
    %c0_29 = arith.constant 0 : index
    %c0_30 = arith.constant 0 : index
    %c0_31 = arith.constant 0 : index
    %41 = vector.load %arg9[%c0_29, %c0_30, %c0_31] : memref<2x1x128xf32, #tpu.memory_space<vmem>>, vector<1x1x128xf32>
    %42 = vector.shape_cast %41 : vector<1x1x128xf32> to vector<1x128xf32>
    %cst_32 = arith.constant dense<0.000000e+00> : vector<8x128xf32>
    %43 = tpu.matmul %12, %38, %cst_32 {dimension_numbers = #tpu.dot_dimension_numbers<[1], [0], [0], [1], [0, 0, 1, 1], [], []>} : vector<8x128xbf16>, vector<128x128xbf16>, vector<8x128xf32> -> vector<8x128xf32>
    %44 = vector.broadcast %42 : vector<1x128xf32> to vector<8x128xf32>
    %45 = arith.addf %43, %44 : vector<8x128xf32>
    %cst_33 = arith.constant 0.000000e+00 : f32
    %46 = vector.broadcast %cst_33 : f32 to vector<8x128xf32>
    %47 = arith.maximumf %45, %46 : vector<8x128xf32>
    %48 = vector.extract_strided_slice %34 {offsets = [0, 0], sizes = [8, 1], strides = [1, 1]} : vector<8x2xf32> to vector<8x1xf32>
    %49 = arith.truncf %47 : vector<8x128xf32> to vector<8x128xbf16>
    %cst_34 = arith.constant dense<0.000000e+00> : vector<8x128xf32>
    %50 = tpu.matmul %49, %40, %cst_34 {dimension_numbers = #tpu.dot_dimension_numbers<[1], [0], [0], [1], [0, 0, 1, 1], [], []>} : vector<8x128xbf16>, vector<128x128xbf16>, vector<8x128xf32> -> vector<8x128xf32>
    %51 = vector.broadcast %48 : vector<8x1xf32> to vector<8x128xf32>
    %52 = arith.mulf %51, %50 : vector<8x128xf32>
    %53 = arith.addf %36, %52 : vector<8x128xf32>
    %c1_35 = arith.constant 1 : index
    %c0_36 = arith.constant 0 : index
    %c0_37 = arith.constant 0 : index
    %c0_38 = arith.constant 0 : index
    %54 = vector.load %arg8[%c1_35, %c0_36, %c0_37, %c0_38] : memref<2x2x128x128xbf16, #tpu.memory_space<vmem>>, vector<1x1x128x128xbf16>
    %55 = vector.shape_cast %54 : vector<1x1x128x128xbf16> to vector<128x128xbf16>
    %c1_39 = arith.constant 1 : index
    %c1_40 = arith.constant 1 : index
    %c0_41 = arith.constant 0 : index
    %c0_42 = arith.constant 0 : index
    %56 = vector.load %arg8[%c1_39, %c1_40, %c0_41, %c0_42] : memref<2x2x128x128xbf16, #tpu.memory_space<vmem>>, vector<1x1x128x128xbf16>
    %57 = vector.shape_cast %56 : vector<1x1x128x128xbf16> to vector<128x128xbf16>
    %c1_43 = arith.constant 1 : index
    %c0_44 = arith.constant 0 : index
    %c0_45 = arith.constant 0 : index
    %58 = vector.load %arg9[%c1_43, %c0_44, %c0_45] : memref<2x1x128xf32, #tpu.memory_space<vmem>>, vector<1x1x128xf32>
    %59 = vector.shape_cast %58 : vector<1x1x128xf32> to vector<1x128xf32>
    %cst_46 = arith.constant dense<0.000000e+00> : vector<8x128xf32>
    %60 = tpu.matmul %12, %55, %cst_46 {dimension_numbers = #tpu.dot_dimension_numbers<[1], [0], [0], [1], [0, 0, 1, 1], [], []>} : vector<8x128xbf16>, vector<128x128xbf16>, vector<8x128xf32> -> vector<8x128xf32>
    %61 = vector.broadcast %59 : vector<1x128xf32> to vector<8x128xf32>
    %62 = arith.addf %60, %61 : vector<8x128xf32>
    %cst_47 = arith.constant 0.000000e+00 : f32
    %63 = vector.broadcast %cst_47 : f32 to vector<8x128xf32>
    %64 = arith.maximumf %62, %63 : vector<8x128xf32>
    %65 = vector.extract_strided_slice %34 {offsets = [0, 1], sizes = [8, 1], strides = [1, 1]} : vector<8x2xf32> to vector<8x1xf32>
    %66 = arith.truncf %64 : vector<8x128xf32> to vector<8x128xbf16>
    %cst_48 = arith.constant dense<0.000000e+00> : vector<8x128xf32>
    %67 = tpu.matmul %66, %57, %cst_48 {dimension_numbers = #tpu.dot_dimension_numbers<[1], [0], [0], [1], [0, 0, 1, 1], [], []>} : vector<8x128xbf16>, vector<128x128xbf16>, vector<8x128xf32> -> vector<8x128xf32>
    %68 = vector.broadcast %65 : vector<8x1xf32> to vector<8x128xf32>
    %69 = arith.mulf %68, %67 : vector<8x128xf32>
    %70 = arith.addf %53, %69 : vector<8x128xf32>
    %c0_49 = arith.constant 0 : index
    %c0_50 = arith.constant 0 : index
    %71 = vector.load %arg10[%c0_49, %c0_50] : memref<8x128xf32, #tpu.memory_space<vmem>>, vector<8x128xf32>
    tpu.vector_store %arg10[%c0_49, %c0_50], %70 {strides = array<i32>} : memref<8x128xf32, #tpu.memory_space<vmem>>, vector<8x128xf32>,
    return
  }
  func.func @transform_0(%arg0: i32) -> (i32, i32, i32) {
    %c0_i32 = arith.constant 0 : i32
    %c0_i32_0 = arith.constant 0 : i32
    %c0_i32_1 = arith.constant 0 : i32
    return %arg0, %c0_i32, %c0_i32_0 : i32, i32, i32
  }
  func.func @transform_1(%arg0: i32) -> (i32, i32) {
    %c0_i32 = arith.constant 0 : i32
    %c0_i32_0 = arith.constant 0 : i32
    return %arg0, %c0_i32 : i32, i32
  }
  func.func @transform_2(%arg0: i32) -> (i32, i32) {
    %c0_i32 = arith.constant 0 : i32
    %c0_i32_0 = arith.constant 0 : i32
    %c0_i32_1 = arith.constant 0 : i32
    return %c0_i32, %c0_i32_0 : i32, i32
  }
  func.func @transform_3(%arg0: i32) -> (i32, i32) {
    %c0_i32 = arith.constant 0 : i32
    %c0_i32_0 = arith.constant 0 : i32
    %c0_i32_1 = arith.constant 0 : i32
    return %c0_i32, %c0_i32_0 : i32, i32
  }
  func.func @transform_4(%arg0: i32) -> (i32, i32) {
    %c0_i32 = arith.constant 0 : i32
    %c0_i32_0 = arith.constant 0 : i32
    %c0_i32_1 = arith.constant 0 : i32
    return %c0_i32, %c0_i32_0 : i32, i32
  }
  func.func @transform_5(%arg0: i32) -> (i32, i32) {
    %c0_i32 = arith.constant 0 : i32
    %c0_i32_0 = arith.constant 0 : i32
    %c0_i32_1 = arith.constant 0 : i32
    return %c0_i32, %c0_i32_0 : i32, i32
  }
  func.func @transform_6(%arg0: i32) -> (i32, i32) {
    %c0_i32 = arith.constant 0 : i32
    %c0_i32_0 = arith.constant 0 : i32
    %c0_i32_1 = arith.constant 0 : i32
    return %c0_i32, %c0_i32_0 : i32, i32
  }
  func.func @transform_7(%arg0: i32) -> (i32, i32, i32, i32) {
    %c0_i32 = arith.constant 0 : i32
    %c0_i32_0 = arith.constant 0 : i32
    %c0_i32_1 = arith.constant 0 : i32
    %c0_i32_2 = arith.constant 0 : i32
    %c0_i32_3 = arith.constant 0 : i32
    return %c0_i32, %c0_i32_0, %c0_i32_1, %c0_i32_2 : i32, i32, i32, i32
  }
  func.func @transform_8(%arg0: i32) -> (i32, i32, i32) {
    %c0_i32 = arith.constant 0 : i32
    %c0_i32_0 = arith.constant 0 : i32
    %c0_i32_1 = arith.constant 0 : i32
    %c0_i32_2 = arith.constant 0 : i32
    return %c0_i32, %c0_i32_0, %c0_i32_1 : i32, i32, i32
  }
  func.func @transform_9(%arg0: i32) -> (i32, i32) {
    %c0_i32 = arith.constant 0 : i32
    %c0_i32_0 = arith.constant 0 : i32
    return %arg0, %c0_i32 : i32, i32
  }
}

</mosaic_0001>

<bundles_post_ra>
// kernel: tpu_custom_call.1
= control target key start
LH: loop header
LB: loop body
LE: loop exit
PB: predicated region body
PF: predicated region fallthrough
CT: control target
= control target key end

     0   :  { %14 = vsyncpa [#allocation3], 0  ;;  %s1733_s0 = inlined_call_operand.vmem [shape: f32[8,8,128], index: 0, kind: input, shape index: {}]   ;;  %s1734_s1 = inlined_call_operand.hbm [shape: f32[8,8], index: 1, kind: input, shape index: {}]   ;;  %s1735_s2 = inlined_call_operand.hbm [shape: bf16[128,128], index: 2, kind: input, shape index: {}]   ;;  %s1736_s3 = inlined_call_operand.hbm [shape: f32[1,128], index: 3, kind: input, shape index: {}]   ;;  %s1737_s4 = inlined_call_operand.vmem [shape: bf16[128,2], index: 4, kind: input, shape index: {}]   ;;  %s1738_s5 = inlined_call_operand.vmem [shape: f32[1,2], index: 5, kind: input, shape index: {}]   ;;  %s1739_s6 = inlined_call_operand.vmem [shape: f32[2,128], index: 6, kind: input, shape index: {}]   ;;  %s1740_s7 = inlined_call_operand.hbm [shape: bf16[2,2,128,128], index: 7, kind: input, shape index: {}]   ;;  %s1741_s8 = inlined_call_operand.vmem [shape: f32[2,1,128], index: 8, kind: input, shape index: {}]   ;;  %s1742_s9 = inlined_call_operand.hbm [shape: f32[8,128], index: 9, kind: output, shape index: {}]  }
   0x1   :  { %15 = vsyncpa [#allocation6], 0 }
   0x2   :  { %16 = vsyncpa [#allocation9], 0  ;;  %s35_s11 = sshll.u32 %s1735_s2, 4  ;;  %s36_s11 = int_to_ptr.hbm [resolvable:$true] %s35_s11 }
   0x3   :  { %17 = vsyncpa [#allocation4], 0  ;;  %s1382_s12 = smov [#allocation5]   ;;  %s25_s16 = sshll.u32 %s1734_s1, 4  ;;  %s26_s16 = int_to_ptr.hbm [resolvable:$true] %s25_s16 }
   0x4   :  { %s37_s13 = sshll.u32 %s1382_s12, 4  ;;  %s1383_s17 = smov 64   ;;  %s38_s13 = int_to_ptr.vmem [resolvable:$true] %s37_s13 }
   0x5   :  { %s1384_s18 = smov 4   ;;  %s1385_s19 = smov [#allocation2]  }
   0x6   :  { %43 = dma.hbm_to_vmem [thread:$0]  %s36_s11, 1024, %s38_s13, [#allocation6], %s1383_s17, %s1383_s17, %s1384_s18  }
   0x7   :  { %s27_s20 = sshll.u32 %s1385_s19, 4  ;;  %s49_s23 = sshll.u32 %s1736_s3, 4  ;;  %s28_s20 = int_to_ptr.vmem [resolvable:$true] %s27_s20  ;;  %s50_s23 = int_to_ptr.hbm [resolvable:$true] %s49_s23 }
   0x8   :  { %30 = dma.hbm_to_vmem [thread:$0]  %s26_s16, 128, %s28_s20, [#allocation3]  }
   0x9   :  { %s65_s25 = sshll.u32 %s1740_s7, 4  ;;  %s1386_s26 = smov [#allocation7]   ;;  %s66_s25 = int_to_ptr.hbm [resolvable:$true] %s65_s25 }
   0xa   :  { %s51_s27 = sshll.u32 %s1386_s26, 4  ;;  %s1387_s1 = smov [#allocation8]   ;;  %s52_s27 = int_to_ptr.vmem [resolvable:$true] %s51_s27 }
   0xb   :  { %54 = dma.hbm_to_vmem [thread:$0]  %s50_s23, 16, %s52_s27, [#allocation6]  }
   0xc   :  { %s67_s28 = sshll.u32 %s1387_s1, 4  ;;  %s68_s28 = int_to_ptr.vmem [resolvable:$true] %s67_s28 }
   0xd   :  { %73 = dma.hbm_to_vmem [thread:$0]  %s66_s25, 4096, %s68_s28, [#allocation9], %s1383_s17, %s1383_s17, %s1384_s18  }
   0xe   :  { %1374 = dma.done.wait [#allocation3], 128  }
   0xf   :  { %1375 = vsyncadd [#allocation3], 4294967168 }
  0x10   :  { %1376 = dma.done.wait [#allocation6], 1040  }
  0x11   :  { %1377 = vsyncadd [#allocation6], 4294966256 }
  0x12   :  { %1378 = dma.done.wait [#allocation9], 4096  }
  0x13   :  { %1379 = vsyncadd [#allocation9], 4294963200  ;;  %v107_v0 = vlaneseq  ;;  %vm101_vm0 = vcmask 64512   ;;  %v100_v2 = vld [vmem:[#allocation2] sm:$0xff]  ;;  %v95_v14 = vld [vmem:[%s1733_s0 + $0x18] sm:$0xff]  ;;  %s961_s20 = sshll.u32 %s1742_s9, 4  ;;  %s962_s20 = int_to_ptr.hbm [resolvable:$true] %s961_s20 }
  0x14   :  { %v102_v3 = vsel %vm101_vm0, %v100_v2, 0.0  ;;  %v120_v4 = vperm.slane %v100_v2, 2  ;;  %v127_v5 = vperm.slane %v100_v2, 3  ;;  %v106_v6 = vperm.slane %v100_v2, 0  ;;  %v98_v17 = vld [vmem:[%s1733_s0 + $0x30] sm:$0xff]  ;;  %v96_v18 = vld [vmem:[%s1733_s0 + $0x20] sm:$0xff] }
  0x15   :  { %v108_v1 = vshrl.u32 %v107_v0, 7  ;;  %103 = vadd.xlane.f32.xlu0 %v102_v3  ;;  %v134_v7 = vperm.slane %v100_v2, 4  ;;  %v141_v8 = vperm.slane %v100_v2, 5  ;;  %v148_v9 = vperm.slane %v100_v2, 6  ;;  %v94_v24 = vld [vmem:[%s1733_s0 + $0x10] sm:$0xff]  ;;  %v1175_v29 = vld [vmem:[#allocation5 + $0x38] sm:$0xff] }
  0x16   :  { %v113_v10 = vperm.slane %v100_v2, 1  ;;  %v155_v11 = vperm.slane %v100_v2, 7  ;;  %v1191_v30 = vld [vmem:[#allocation8 + $0x38] sm:$0xff]  ;;  %469 = vmatpush.bf16.msra.mxu0 %v1175_v29  ;;  %v1174_v36 = vld [vmem:[#allocation5 + $0x30] sm:$0xff]  ;;  %v1173_v59 = vld [vmem:[#allocation5 + $0x28] sm:$0xff] }
  0x17   :  { %1226 = vset.pattern.permute.xlu1 %v108_v1  ;;  %1227 = vset.pattern.permute.xlu2 %v108_v1  ;;  %v1190_v37 = vld [vmem:[#allocation8 + $0x30] sm:$0xff]  ;;  %v97_v58 = vld [vmem:[%s1733_s0 + $0x28] sm:$0xff]  ;;  %v1189_v60 = vld [vmem:[#allocation8 + $0x28] sm:$0xff] }
  0x18   :  { %1225 = vset.pattern.permute.xlu0 %v108_v1  ;;  %676 = vmatpush.bf16.msra.mxu2 %v1191_v30  ;;  %v92_v43 = vld [vmem:[%s1733_s0] sm:$0xff] }
  0x1a   :  { %470 = vmatpush.bf16.msra.mxu0 %v1174_v36 }
  0x1c   :  { %677 = vmatpush.bf16.msra.mxu2 %v1190_v37 }
  0x1e   :  { %471 = vmatpush.bf16.msra.mxu0 %v1173_v59 }
  0x1f   :  { %125 = vperm.xlu1 %1226, %v120_v4   ;;  %132 = vperm.xlu2 %1227, %v127_v5   ;;  %v1172_v4 = vld [vmem:[#allocation5 + $0x20] sm:$0xff] }
  0x20   :  { %678 = vmatpush.bf16.msra.mxu2 %v1189_v60  ;;  %v1188_v5 = vld [vmem:[#allocation8 + $0x20] sm:$0xff] }
  0x22   :  { %472 = vmatpush.bf16.msra.mxu0 %v1172_v4 }
  0x24   :  { %679 = vmatpush.bf16.msra.mxu2 %v1188_v5 }
  0x27   :  { %111 = vperm.xlu1 %1226, %v106_v6   ;;  %139 = vperm.xlu2 %1227, %v134_v7  }
  0x29   :  { %118 = vperm.xlu0 %1225, %v113_v10  }
  0x2f   :  { %146 = vperm.xlu1 %1226, %v141_v8   ;;  %153 = vperm.xlu2 %1227, %v148_v9  }
  0x37   :  { %160 = vperm.xlu1 %1226, %v155_v11  }
  0x79   :  { %v133_v12 = vpop.permute.xlu2 %132 }
  0x7a   :  { %v165_v15 = vmul.f32 %v133_v12, %v95_v14 }
  0x7c   :  { %v188_v19 = vrot.slane %v165_v15, 4 }
  0x7e   :  { %v189_v25 = vadd.f32 %v188_v19, %v165_v15 }
  0x80   :  { %v190_v33 = vrot.slane %v189_v25, 2 }
  0x81   :  { %v140_v13 = vpop.permute.xlu2 %139 }
  0x82   :  { %v166_v21 = vmul.f32 %v140_v13, %v96_v18  ;;  %v191_v40 = vadd.f32 %v190_v33, %v189_v25  ;;  %v93_v25 = vld [vmem:[%s1733_s0 + $0x8] sm:$0xff] }
  0x84   :  { %v194_v31 = vrot.slane %v166_v21, 4  ;;  %v192_v50 = vrot.slane %v191_v40, 1 }
  0x86   :  { %v195_v38 = vadd.f32 %v194_v31, %v166_v21  ;;  %v1504_v63 = vadd.f32 %v192_v50, %v191_v40  ;;  %v1170_v50 = vld [vmem:[#allocation5 + $0x10] sm:$0xff] }
  0x88   :  { %v104_v22 = vpop.xlane.xlu0 %103  ;;  %v196_v47 = vrot.slane %v195_v38, 2 }
  0x89   :  { %v154_v16 = vpop.permute.xlu2 %153  ;;  %v1462_v23 = vmax.f32 %v104_v22, 1.0 }
  0x8a   :  { %v168_v20 = vmul.f32 %v154_v16, %v98_v17  ;;  %v1498_v56 = vadd.f32 %v196_v47, %v195_v38 }
  0x8b   :  { %v1468_v28 = vrot.slane %v1462_v23, 2  ;;  %v1472_v35 = vrot.slane %v1462_v23, 6  ;;  %v1480_v44 = vrot.slane %v1462_v23, 5  ;;  %v1483_v45 = vrot.slane %v1462_v23, 1 }
  0x8c   :  { %v206_v27 = vrot.slane %v168_v20, 4  ;;  %v1494_v54 = vrot.slane %v1462_v23, 7  ;;  %v245_v2 = vand.u32 2147483648, %v1462_v23  ;;  %v198_v10 = vrot.slane %v1498_v56, 1 }
  0x8d   :  { %1234 = vrcp.f32 %v1468_v28  ;;  %v275_v61 = vand.u32 2147483648, %v1468_v28  ;;  %v335_v12 = vand.u32 2147483648, %v1472_v35  ;;  %v243_v13 = vand.u32 2147483647, %v1462_v23 }
  0x8e   :  { %v207_v34 = vadd.f32 %v206_v27, %v168_v20  ;;  %1236 = vrcp.f32 %v1462_v23  ;;  %vm269_vm1 = vweird.f32 %v1468_v28  ;;  %v273_v15 = vand.u32 2147483647, %v1468_v28  ;;  %v1187_v27 = vld [vmem:[#allocation8 + $0x18] sm:$0xff] }
  0x8f   :  { %1238 = vrcp.f32 %v1472_v35  ;;  %v1521_v16 = vor.u32 1.1754944e-38, %v275_v61  ;;  %v333_v17 = vand.u32 2147483647, %v1472_v35  ;;  %v1526_v21 = vor.u32 1.1754944e-38, %v245_v2  ;;  %680 = vmatpush.bf16.msra.mxu2 %v1187_v27 }
  0x90   :  { %v208_v41 = vrot.slane %v207_v34, 2  ;;  %1240 = vrcp.f32 %v1480_v44  ;;  %vm239_vm2 = vweird.f32 %v1462_v23  ;;  %v1541_v36 = vrot.slane %v1462_v23, 3 }
  0x91   :  { %v126_v26 = vpop.permute.xlu1 %125  ;;  %1242 = vrcp.f32 %v1483_v45  ;;  %vm329_vm4 = vweird.f32 %v1472_v35  ;;  %vm1551_vm6 = vcmp.eq.f32.partialorder %v273_v15, 8.507059e+37  ;;  %v318_v60 = vand.u32 2147483647, %v1480_v44  ;;  %v1169_v15 = vld [vmem:[#allocation5 + $0x8] sm:$0xff] }
  0x92   :  { %v164_v32 = vmul.f32 %v126_v26, %v94_v24  ;;  %v209_v51 = vadd.f32 %v208_v41, %v207_v34  ;;  %1244 = vrcp.f32 %v1494_v54  ;;  %v1171_v26 = vld [vmem:[#allocation5 + $0x18] sm:$0xff]  ;;  %v1536_v34 = vor.u32 1.1754944e-38, %v335_v12 }
  0x93   :  { %v1485_v46 = vpop.eup %1234  ;;  %473 = vmatpush.bf16.msra.mxu0 %v1171_v26  ;;  %vm1563_vm8 = vcmp.eq.f32.partialorder %v333_v17, 8.507059e+37  ;;  %vm254_vm9 = vweird.f32 %v1483_v45  ;;  %vm1579_vm11 = vcmp.eq.f32.partialorder %v243_v13, 8.507059e+37  ;;  %vm314_vm12 = vweird.f32 %v1480_v44  ;;  %v1185_v17 = vld [vmem:[#allocation8 + $0x8] sm:$0xff] }
  0x94   :  { %v182_v39 = vrot.slane %v164_v32, 4  ;;  %v1488_v52 = vpop.eup %1236  ;;  %v265_v53 = vmul.f32 %v1485_v46, %v1468_v28  ;;  %v210_v0 = vrot.slane %v209_v51, 1  ;;  %vm270_vm5 = vweird.f32 %v1485_v46 }
  0x95   :  { %v1496_v55 = vpop.eup %1238  ;;  %v235_v1 = vmul.f32 %v1488_v52, %v1462_v23  ;;  %vm240_vm3 = vweird.f32 %v1488_v52  ;;  %vm1574_vm10 = vmor %vm269_vm1, %vm270_vm5  ;;  %vm1612_vm0 = vcmp.eq.f32.partialorder %v318_v60, 8.507059e+37  ;;  %1246 = vrcp.f32 %v1541_v36  ;;  %v1178_v60 = vld [vmem:[%s1737_s4 + $0x10] sm:$0xff] }
  0x96   :  { %v183_v48 = vadd.f32 %v182_v39, %v164_v32  ;;  %v266_v6 = vsub.f32 1.0, %v265_v53  ;;  %v325_v7 = vmul.f32 %v1496_v55, %v1472_v35  ;;  %v1512_v9 = vpop.eup %1240  ;;  %v1524_v19 = vadd.f32 %v210_v0, %v209_v51  ;;  %v1186_v51 = vld [vmem:[#allocation8 + $0x10] sm:$0xff]  ;;  %vm1595_vm14 = vmor %vm239_vm2, %vm240_vm3 }
  0x97   :  { %v1517_v14 = vpop.eup %1242  ;;  %v236_v20 = vsub.f32 1.0, %v235_v1  ;;  %v310_v31 = vmul.f32 %v1512_v9, %v1480_v44  ;;  %v320_v39 = vand.u32 2147483648, %v1480_v44  ;;  %vm330_vm7 = vweird.f32 %v1496_v55  ;;  %474 = vmatpush.bf16.msra.mxu0 %v1170_v50  ;;  %681 = vmatpush.bf16.msra.mxu2 %v1186_v51  ;;  %v1199_v51 = vld [vmem:[#allocation8 + $0x78] sm:$0xff] }
  0x98   :  { %v184_v57 = vrot.slane %v183_v48, 2  ;;  %v267_v29 = vmul.f32 %v1485_v46, %v266_v6  ;;  %v326_v30 = vsub.f32 1.0, %v325_v7  ;;  %v250_v32 = vmul.f32 %v1517_v14, %v1483_v45  ;;  %v1543_v37 = vpop.eup %1244  ;;  %vm1608_vm15 = vmor %vm329_vm4, %vm330_vm7  ;;  %739 = vmatpush.bf16.msra.mxu3 %v1199_v51 }
  0x99   :  { %v112_v42 = vpop.permute.xlu1 %111  ;;  %v237_v47 = vmul.f32 %v1488_v52, %v236_v20  ;;  %v340_v0 = vmul.f32 %v1543_v37, %v1494_v54  ;;  %v1567_v4 = vor.u32 1.1754944e-38, %v320_v39  ;;  %vm255_vm13 = vweird.f32 %v1517_v14 }
  0x9a   :  { %v162_v49 = vmul.f32 %v112_v42, %v92_v43  ;;  %v185_v11 = vadd.f32 %v184_v57, %v183_v48  ;;  %v251_v40 = vsub.f32 1.0, %v250_v32  ;;  %v99_v42 = vld [vmem:[%s1733_s0 + $0x38] sm:$0xff]  ;;  %v268_v53 = vadd.f32 %v1485_v46, %v267_v29  ;;  %vm1631_vm2 = vmor %vm254_vm9, %vm255_vm13 }
  0x9b   :  { %v119_v24 = vpop.permute.xlu0 %118  ;;  %v327_v57 = vmul.f32 %v1496_v55, %v326_v30  ;;  %v238_v6 = vadd.f32 %v1488_v52, %v237_v47  ;;  %v260_v29 = vand.u32 2147483648, %v1483_v45  ;;  %v1602_v30 = vrot.slane %v1462_v23, 4  ;;  %475 = vmatpush.bf16.msra.mxu0 %v1169_v15  ;;  %682 = vmatpush.bf16.msra.mxu2 %v1185_v17  ;;  %v1184_v23 = vld [vmem:[#allocation8] sm:$0xff] }
  0x9c   :  { %v170_v62 = vrot.slane %v162_v49, 4  ;;  %v186_v33 = vrot.slane %v185_v11, 1  ;;  %v163_v41 = vmul.f32 %v119_v24, %v93_v25  ;;  %v252_v61 = vmul.f32 %v1517_v14, %v251_v40  ;;  %v1168_v40 = vld [vmem:[#allocation5] sm:$0xff] }
  0x9d   :  { %v272_v28 = vsel %vm1574_vm10, %v1485_v46, %v268_v53  ;;  %v341_v25 = vsub.f32 1.0, %v340_v0  ;;  %v258_v46 = vand.u32 2147483647, %v1483_v45  ;;  %vm315_vm1 = vweird.f32 %v1512_v9  ;;  %v1198_v0 = vld [vmem:[#allocation8 + $0x70] sm:$0xff] }
  0x9e   :  { %v171_v18 = vadd.f32 %v170_v62, %v162_v49  ;;  %v176_v59 = vrot.slane %v163_v41, 4  ;;  %v187_v1 = vadd.f32 %v186_v33, %v185_v11  ;;  %v253_v20 = vadd.f32 %v1517_v14, %v252_v61  ;;  %vm1654_vm4 = vmor %vm314_vm12, %vm315_vm1  ;;  %740 = vmatpush.bf16.msra.mxu3 %v1198_v0 }
  0x9f   :  { %v277_v35 = vsel %vm1551_vm6, %v1521_v16, %v272_v28  ;;  %v261_v50 = vor.u32 1.1754944e-38, %v260_v29  ;;  %1248 = vrcp.f32 %v1602_v30  ;;  %vm259_vm3 = vcmp.eq.f32.partialorder %v258_v46, 8.507059e+37  ;;  %476 = vmatpush.bf16.msra.mxu0 %v1168_v40  ;;  %683 = vmatpush.bf16.msra.mxu2 %v1184_v23 }
  0xa0   :  { %v172_v38 = vrot.slane %v171_v18, 2  ;;  %v177_v11 = vadd.f32 %v176_v59, %v163_v41  ;;  %vm345_vm5 = vweird.f32 %v1543_v37  ;;  %vm399_vm6 = vcmask 1041409  }
  0xa1   :  { %v147_v3 = vpop.permute.xlu1 %146  ;;  %vm344_vm7 = vweird.f32 %v1494_v54 }
  0xa2   :  { %v167_v8 = vmul.f32 %v147_v3, %v97_v58  ;;  %v311_v58 = vsub.f32 1.0, %v310_v31  ;;  %v173_v3 = vadd.f32 %v172_v38, %v171_v18  ;;  %v328_v18 = vadd.f32 %v1496_v55, %v327_v57 }
  0xa4   :  { %v200_v22 = vrot.slane %v167_v8, 4  ;;  %v312_v13 = vmul.f32 %v1512_v9, %v311_v58  ;;  %v174_v26 = vrot.slane %v173_v3, 1  ;;  %v332_v41 = vsel %vm1608_vm15, %v1496_v55, %v328_v18 }
  0xa5   :  { %v257_v55 = vsel %vm1631_vm2, %v1517_v14, %v253_v20  ;;  %v337_v53 = vsel %vm1563_vm8, %v1536_v34, %v332_v41  ;;  %v278_v58 = vmul.f32 %v277_v35, %v187_v1  ;;  %v350_v34 = vand.u32 2147483648, %v1494_v54  ;;  %v1247_v1 = vpop.eup %1246  ;;  %vm1676_vm8 = vmor %vm344_vm7, %vm345_vm5  ;;  %v1197_v20 = vld [vmem:[#allocation8 + $0x68] sm:$0xff] }
  0xa6   :  { %v201_v48 = vadd.f32 %v200_v22, %v167_v8  ;;  %v178_v22 = vrot.slane %v177_v11, 2  ;;  %v313_v16 = vadd.f32 %v1512_v9, %v312_v13  ;;  %v262_v61 = vsel %vm259_vm3, %v261_v50, %v257_v55  ;;  %v1181_v13 = vld [vmem:[%s1737_s4 + $0x28] sm:$0xff]  ;;  %741 = vmatpush.bf16.msra.mxu3 %v1197_v20  ;;  %v1179_v50 = vld [vmem:[%s1737_s4 + $0x18] sm:$0xff] }
  0xa7   :  { %v280_v7 = vmul.f32 %v1247_v1, %v1541_v36  ;;  %v356_v15 = vpack.c.bf16 %v278_v58, %v278_v58  ;;  %v351_v28 = vor.u32 1.1754944e-38, %v350_v34  ;;  %vm285_vm9 = vweird.f32 %v1247_v1  ;;  %v1194_v20 = vld [vmem:[#allocation8 + $0x50] sm:$0xff] }
  0xa8   :  { %v202_v8 = vrot.slane %v201_v48, 2  ;;  %v179_v38 = vadd.f32 %v178_v22, %v177_v11  ;;  %v288_v22 = vand.u32 2147483647, %v1541_v36  ;;  %v303_v35 = vand.u32 2147483647, %v1602_v30 }
  0xa9   :  { %v161_v49 = vpop.permute.xlu1 %160  ;;  %v281_v18 = vsub.f32 1.0, %v280_v7  ;;  %vm299_vm15 = vweird.f32 %v1602_v30  ;;  %vm402_vm2 = vcmask 1042434   ;;  %vm405_vm3 = vcmask 1043459  }
  0xaa   :  { %v169_v62 = vmul.f32 %v161_v49, %v99_v42  ;;  %v203_v32 = vadd.f32 %v202_v8, %v201_v48  ;;  %v242_v42 = vsel %vm1595_vm14, %v1488_v52, %v238_v6  ;;  %v180_v43 = vrot.slane %v179_v38, 1  ;;  %v1183_v52 = vld [vmem:[%s1737_s4 + $0x38] sm:$0xff] }
  0xab   :  { %v342_v48 = vmul.f32 %v1543_v37, %v341_v25  ;;  %v175_v49 = vadd.f32 %v174_v26, %v173_v3  ;;  %v247_v59 = vsel %vm1579_vm11, %v1526_v21, %v242_v42  ;;  %552 = vmatpush.bf16.msra.mxu1 %v1183_v52  ;;  %v317_v21 = vsel %vm1654_vm4, %v1512_v9, %v313_v16  ;;  %v1249_v9 = vpop.eup %1248 }
  0xac   :  { %v212_v12 = vrot.slane %v169_v62, 4  ;;  %v204_v57 = vrot.slane %v203_v32, 1  ;;  %v181_v14 = vadd.f32 %v180_v43, %v179_v38  ;;  %v1668_v3 = vmul.f32 %v337_v53, %v1524_v19  ;;  %v1180_v38 = vld [vmem:[%s1737_s4 + $0x20] sm:$0xff] }
  0xad   :  { %v343_v2 = vadd.f32 %v1543_v37, %v342_v48  ;;  %v248_v5 = vmul.f32 %v247_v59, %v175_v49  ;;  %v322_v17 = vsel %vm1612_vm0, %v1567_v4, %v317_v21  ;;  %v290_v4 = vand.u32 2147483648, %v1541_v36  ;;  %v1207_v19 = vld [vmem:[#allocation8 + $0xb8] sm:$0xff] }
  0xae   :  { %v213_v24 = vadd.f32 %v212_v12, %v169_v62  ;;  %v1182_v62 = vld [vmem:[%s1737_s4 + $0x30] sm:$0xff]  ;;  %v263_v44 = vmul.f32 %v262_v61, %v181_v14  ;;  %v205_v8 = vadd.f32 %v204_v57, %v203_v32  ;;  %v348_v12 = vand.u32 2147483647, %v1494_v54 }
  0xaf   :  { %553 = vmatpush.bf16.msra.mxu1 %v1182_v62  ;;  %v347_v54 = vsel %vm1676_vm8, %v1543_v37, %v343_v2  ;;  %v282_v27 = vmul.f32 %v1247_v1, %v281_v18  ;;  %v354_v46 = vpack.c.bf16 %v248_v5, %v248_v5  ;;  %vm284_vm11 = vweird.f32 %v1541_v36  ;;  %v1206_v18 = vld [vmem:[#allocation8 + $0xb0] sm:$0xff] }
  0xb0   :  { %v214_v39 = vrot.slane %v213_v24, 2  ;;  %v355_v11 = vpack.c.bf16 %v263_v44, %v263_v44  ;;  %v323_v29 = vmul.f32 %v322_v17, %v205_v8  ;;  %vm349_vm10 = vcmp.eq.f32.partialorder %v348_v12, 8.507059e+37  ;;  %vm286_vm12 = vmor %vm284_vm11, %vm285_vm9 }
  0xb1   :  { %v352_v32 = vsel %vm349_vm10, %v351_v28, %v347_v54  ;;  %v283_v33 = vadd.f32 %v1247_v1, %v282_v27  ;;  %v305_v37 = vand.u32 2147483648, %v1602_v30  ;;  %v291_v40 = vor.u32 1.1754944e-38, %v290_v4  ;;  %v1204_v54 = vld [vmem:[#allocation8 + $0xa0] sm:$0xff]  ;;  %v1203_v4 = vld [vmem:[#allocation8 + $0x98] sm:$0xff] }
  0xb2   :  { %v215_v45 = vadd.f32 %v214_v39, %v213_v24  ;;  %v295_v24 = vmul.f32 %v1249_v9, %v1602_v30  ;;  %v391_v25 = vunpack.c.l.b16 %v355_v11  ;;  %v1196_v39 = vld [vmem:[#allocation8 + $0x60] sm:$0xff]  ;;  %vm300_vm13 = vweird.f32 %v1249_v9 }
  0xb3   :  { %554 = vmatpush.bf16.msra.mxu1 %v1181_v13  ;;  %v287_v47 = vsel %vm286_vm12, %v1247_v1, %v283_v33  ;;  %vm289_vm14 = vcmp.eq.f32.partialorder %v288_v22, 8.507059e+37  ;;  %v392_v36 = vunpack.c.l.b16 %v356_v15  ;;  %v199_v43 = vadd.f32 %v198_v10, %v1498_v56  ;;  %vm301_vm0 = vmor %vm299_vm15, %vm300_vm13  ;;  %742 = vmatpush.bf16.msra.mxu3 %v1196_v39  ;;  %v1205_v13 = vld [vmem:[#allocation8 + $0xa8] sm:$0xff]  ;;  %v1200_v27 = vld [vmem:[#allocation8 + $0x80] sm:$0xff] }
  0xb4   :  { %v216_v6 = vrot.slane %v215_v45, 1  ;;  %v296_v31 = vsub.f32 1.0, %v295_v24  ;;  %v398_v41 = vrot.slane %v391_v25, 7  ;;  %v292_v16 = vsel %vm289_vm14, %v291_v40, %v287_v47  ;;  %v1193_v22 = vld [vmem:[#allocation8 + $0x48] sm:$0xff]  ;;  %v1192_v24 = vld [vmem:[#allocation8 + $0x40] sm:$0xff]  ;;  %v1202_v25 = vld [vmem:[#allocation8 + $0x90] sm:$0xff] }
  0xb5   :  { %v390_v48 = vunpack.c.l.b16 %v354_v46  ;;  %v293_v52 = vmul.f32 %v292_v16, %v1504_v63  ;;  %v306_v49 = vor.u32 1.1754944e-38, %v305_v37  ;;  %v359_v51 = vpack.c.bf16 %v323_v29, %v323_v29  ;;  %v1215_v46 = vld [vmem:[#allocation8 + $0xf8] sm:$0xff]  ;;  %v1214_v29 = vld [vmem:[#allocation8 + $0xf0] sm:$0xff]  ;;  %v1212_v16 = vld [vmem:[#allocation8 + $0xe0] sm:$0xff] }
  0xb6   :  { %v217_v26 = vadd.f32 %v216_v6, %v215_v45  ;;  %v297_v23 = vmul.f32 %v1249_v9, %v296_v31  ;;  %v1195_v45 = vld [vmem:[#allocation8 + $0x58] sm:$0xff]  ;;  %vm304_vm1 = vcmp.eq.f32.partialorder %v303_v35, 8.507059e+37  ;;  %v401_v14 = vrot.slane %v392_v36, 6  ;;  %934 = vmatpush.bf16.msrb.mxu2 %v1215_v46  ;;  %v1213_v36 = vld [vmem:[#allocation8 + $0xe8] sm:$0xff] }
  0xb7   :  { %555 = vmatpush.bf16.msra.mxu1 %v1180_v38  ;;  %v400_v30 = vsel %vm399_vm6, %v398_v41, %v390_v48  ;;  %v357_v10 = vpack.c.bf16 %v293_v52, %v293_v52  ;;  %v360_v63 = vpack.c.bf16 %v1668_v3, %v1668_v3  ;;  %743 = vmatpush.bf16.msra.mxu3 %v1195_v45  ;;  %v395_v62 = vunpack.c.l.b16 %v359_v51  ;;  %v1177_v3 = vld [vmem:[%s1737_s4 + $0x8] sm:$0xff]  ;;  %v1231_v38 = vld [vmem:[%s1741_s8] ss:$0 sm:$0xff]  ;;  %v1209_v48 = vld [vmem:[#allocation8 + $0xc8] sm:$0xff] }
  0xb8   :  { %v353_v42 = vmul.f32 %v352_v32, %v217_v26  ;;  %v298_v55 = vadd.f32 %v1249_v9, %v297_v23  ;;  %v403_v34 = vsel %vm402_vm2, %v401_v14, %v400_v30  ;;  %vm408_vm4 = vcmask 1044484   ;;  %v1201_v26 = vld [vmem:[#allocation8 + $0x88] sm:$0xff]  ;;  %v1230_v31 = vld [vmem:[#allocation7] ss:$0 sm:$0xff]  ;;  %v1208_v52 = vld [vmem:[#allocation8 + $0xc0] sm:$0xff] }
  0xb9   :  { %v393_v59 = vunpack.c.l.b16 %v357_v10  ;;  %v396_v21 = vunpack.c.l.b16 %v360_v63  ;;  %vm411_vm5 = vcmask 1045509   ;;  %v410_v6 = vrot.slane %v395_v62, 3 }
  0xba   :  { %v302_v53 = vsel %vm301_vm0, %v1249_v9, %v298_v55  ;;  %v361_v57 = vpack.c.bf16 %v353_v42, %v353_v42  ;;  %vm414_vm6 = vcmask 1046534   ;;  %vm417_vm7 = vcmask 1047559   ;;  %v1176_v9 = vld [vmem:[%s1737_s4] sm:$0xff]  ;;  %935 = vmatpush.bf16.msrb.mxu2 %v1214_v29 }
  0xbb   :  { %v307_v56 = vsel %vm304_vm1, %v306_v49, %v302_v53  ;;  %556 = vmatpush.bf16.msra.mxu1 %v1179_v50  ;;  %v404_v1 = vrot.slane %v393_v59, 5  ;;  %v413_v8 = vrot.slane %v396_v21, 2  ;;  %744 = vmatpush.bf16.msra.mxu3 %v1194_v20  ;;  %v1211_v55 = vld [vmem:[#allocation8 + $0xd8] sm:$0xff]  ;;  %v1232_v49 = vld [vmem:[%s1738_s5] ss:$0 sm:$0xff]  ;;  %vm565_vm8 = vcmask 15360  }
  0xbc   :  { %v308_v58 = vmul.f32 %v307_v56, %v199_v43  ;;  %v397_v0 = vunpack.c.l.b16 %v361_v57  ;;  %v1210_v43 = vld [vmem:[#allocation8 + $0xd0] sm:$0xff]  ;;  %vm760_vm9 = vcmask 1041408  }
  0xbd   :  { %v406_v2 = vsel %vm405_vm3, %v404_v1, %v403_v34  ;;  %v1233_v57 = vld [vmem:[%s1741_s8 + $0x1] ss:$0 sm:$0xff] }
  0xbe   :  { %v358_v61 = vpack.c.bf16 %v308_v58, %v308_v58  ;;  %v416_v7 = vrot.slane %v397_v0, 1  ;;  %936 = vmatpush.bf16.msrb.mxu2 %v1213_v36 }
  0xbf   :  { %557 = vmatpush.bf16.msra.mxu1 %v1178_v60  ;;  %745 = vmatpush.bf16.msra.mxu3 %v1193_v22 }
  0xc0   :  { %v394_v44 = vunpack.c.l.b16 %v358_v61 }
  0xc2   :  { %v407_v5 = vrot.slane %v394_v44, 4  ;;  %937 = vmatpush.bf16.msrb.mxu2 %v1212_v16  ;;  %v590_v44 = vld [vmem:[%s1739_s6] sm:$0x3]  ;;  %s1390_s6 = smov [#allocation10]  }
  0xc3   :  { %558 = vmatpush.bf16.msra.mxu1 %v1177_v3  ;;  %746 = vmatpush.bf16.msra.mxu3 %v1192_v24  ;;  %s959_s8 = sshll.u32 %s1390_s6, 4  ;;  %s960_s8 = int_to_ptr.vmem [resolvable:$true] %s959_s8 }
  0xc4   :  { %v409_v11 = vsel %vm408_vm4, %v407_v5, %v406_v2  ;;  %1101 = vmatpush.msk.msrb.mxu0 %vm760_vm9, %v590_v44  ;;  %v1388_v2 = vmov 0  }
  0xc5   :  { %v412_v12 = vsel %vm411_vm5, %v410_v6, %v409_v11  ;;  %1228 = vset.pattern.permute.xlu0 %v1388_v2 }
  0xc6   :  { %v415_v15 = vsel %vm414_vm6, %v413_v8, %v412_v12  ;;  %938 = vmatpush.bf16.msrb.mxu2 %v1211_v55 }
  0xc7   :  { %v418_v17 = vsel %vm417_vm7, %v416_v7, %v415_v15  ;;  %559 = vmatpush.bf16.msra.mxu1 %v1176_v9 }
  0xc8   :  { %v419_v28 = vpack.c.b16 %v418_v17, %v418_v17 }
  0xca   :  { %477 = vmatmul.bf16.vlgmr.msra.gmra.mxu0 %v419_v28  ;;  %684 = vmatmul.bf16.vlgmr.msra.gmra.mxu2 %v419_v28 }
  0xcb   :  { %871 = vmatpush.bf16.msrb.mxu1 %v1207_v19  ;;  %939 = vmatpush.bf16.msrb.mxu2 %v1210_v43 }
  0xcf   :  { %872 = vmatpush.bf16.msrb.mxu1 %v1206_v18  ;;  %940 = vmatpush.bf16.msrb.mxu2 %v1209_v48  ;;  %v1389_v18 = vmov 1  }
  0xd3   :  { %873 = vmatpush.bf16.msrb.mxu1 %v1205_v13  ;;  %941 = vmatpush.bf16.msrb.mxu2 %v1208_v52 }
  0xd7   :  { %874 = vmatpush.bf16.msrb.mxu1 %v1204_v54 }
  0xdb   :  { %875 = vmatpush.bf16.msrb.mxu1 %v1203_v4 }
  0xdf   :  { %876 = vmatpush.bf16.msrb.mxu1 %v1202_v25 }
  0xe3   :  { %877 = vmatpush.bf16.msrb.mxu1 %v1201_v26 }
  0xe7   :  { %878 = vmatpush.bf16.msrb.mxu1 %v1200_v27 }
 0x147   :  { %v478_v32 = vpop.f32.mrf.mxu0 }
 0x148   :  { %v479_v33 = vadd.f32 %v1230_v31, %v478_v32 }
 0x14a   :  { %v482_v37 = vmax.f32 %v479_v33, 0.0 }
 0x14c   :  { %v483_v39 = vpack.c.bf16 %v482_v37, %v482_v37 }
 0x14d   :  { %v685_v40 = vpop.f32.mrf.mxu2 }
 0x14e   :  { %v686_v23 = vadd.f32 %v1231_v38, %v685_v40  ;;  %560 = vmatmul.bf16.vlgmr.msra.gmra.mxu1 %v483_v39 }
 0x14f   :  { %v480_v35 = vpop.f32.mrf.mxu0 }
 0x150   :  { %v689_v41 = vmax.f32 %v686_v23, 0.0 }
 0x152   :  { %v690_v42 = vpack.c.bf16 %v689_v41, %v689_v41 }
 0x154   :  { %747 = vmatmul.bf16.vlgmr.msra.gmra.mxu3 %v690_v42 }
 0x155   :  { %v687_v47 = vpop.f32.mrf.mxu2 }
 0x15e   :  { %879 = vmatmul.bf16.vlgmr.msrb.gmra.mxu1 %v419_v28 }
 0x1cb   :  { %v561_v50 = vpop.f32.mrf.mxu1 }
 0x1cc   :  { %v562_v45 = vadd.f32 %v1232_v49, %v561_v50 }
 0x1ce   :  { %v566_v51 = vsel %vm565_vm8, %v562_v45, -inf }
 0x1cf   :  { %567 = vmax.xlane.f32.xlu2 %v566_v51 }
 0x1d3   :  { %v563_v53 = vpop.f32.mrf.mxu1 }
 0x1d7   :  { %v748_v30 = vpop.f32.mrf.mxu3 }
 0x1db   :  { %v880_v56 = vpop.f32.mrf.mxu1 }
 0x1dc   :  { %v881_v10 = vadd.f32 %v1233_v57, %v880_v56 }
 0x1de   :  { %v884_v14 = vmax.f32 %v881_v10, 0.0 }
 0x1df   :  { %v750_v63 = vpop.f32.mrf.mxu3 }
 0x1e0   :  { %v885_v58 = vpack.c.bf16 %v884_v14, %v884_v14 }
 0x1e2   :  { %942 = vmatmul.bf16.vlgmr.msrb.gmra.mxu2 %v885_v58 }
 0x1e3   :  { %v882_v59 = vpop.f32.mrf.mxu1 }
 0x242   :  { %v568_v60 = vpop.xlane.xlu2 %567 }
 0x243   :  { %v569_v61 = vsub.f32 %v562_v45, %v568_v60 }
 0x245   :  { %v570_v34 = vmul.f32 1.442695, %v569_v61 }
 0x247   :  { %1250 = vpow2.f32 %v570_v34 }
 0x24d   :  { %v1251_v62 = vpop.eup %1250 }
 0x24e   :  { %v572_v0 = vsel %vm565_vm8, %v1251_v62, 0.0 }
 0x24f   :  { %573 = vadd.xlane.f32.xlu1 %v572_v0 }
 0x265   :  { %v943_v1 = vpop.f32.mrf.mxu2 }
 0x26d   :  { %v945_v21 = vpop.f32.mrf.mxu2 }
 0x2c2   :  { %v574_v3 = vpop.xlane.xlu1 %573 }
 0x2c3   :  { %1252 = vrcp.f32 %v574_v3  ;;  %v586_v8 = vand.u32 2147483648, %v574_v3  ;;  %v584_v12 = vand.u32 2147483647, %v574_v3  ;;  %vm580_vm11 = vweird.f32 %v574_v3 }
 0x2c5   :  { %v587_v15 = vor.u32 1.1754944e-38, %v586_v8  ;;  %vm585_vm13 = vcmp.eq.f32.partialorder %v584_v12, 8.507059e+37 }
 0x2c9   :  { %v1253_v5 = vpop.eup %1252 }
 0x2ca   :  { %v576_v6 = vmul.f32 %v1253_v5, %v574_v3  ;;  %vm581_vm10 = vweird.f32 %v1253_v5 }
 0x2cb   :  { %vm582_vm12 = vmor %vm580_vm11, %vm581_vm10 }
 0x2cc   :  { %v577_v7 = vsub.f32 1.0, %v576_v6 }
 0x2ce   :  { %v578_v11 = vmul.f32 %v1253_v5, %v577_v7 }
 0x2d0   :  { %v579_v9 = vadd.f32 %v1253_v5, %v578_v11 }
 0x2d2   :  { %v583_v17 = vsel %vm582_vm12, %v1253_v5, %v579_v9 }
 0x2d3   :  { %v588_v19 = vsel %vm585_vm13, %v587_v15, %v583_v17 }
 0x2d4   :  { %v589_v28 = vmul.f32 %v1251_v62, %v588_v19 }
 0x2d6   :  { %754 = vperm.xlu0 %1228, %v589_v28   ;;  %1102 = vmatmul.msk.f32.vlgmr.msrb.gmra.mxu0 %vm565_vm8, %v589_v28 }
 0x2de   :  { %1229 = vset.pattern.permute.xlu0 %v1389_v18 }
 0x2df   :  { %948 = vperm.xlu0 %1229, %v589_v28  }
 0x348   :  { %v755_v13 = vpop.permute.xlu0 %754 }
 0x349   :  { %v757_v54 = vmul.f32 %v755_v13, %v748_v30 }
 0x351   :  { %v949_v20 = vpop.permute.xlu0 %948 }
 0x352   :  { %v951_v4 = vmul.f32 %v949_v20, %v943_v1 }
 0x353   :  { %v781_v22 = vpop.f32.mrf.mxu0 }
 0x354   :  { %v782_v24 = vadd.f32 %v781_v22, %v757_v54 }
 0x356   :  { %v952_v25 = vadd.f32 %v951_v4, %v782_v24 }
 0x358   :  { %953 = vst [vmem:[#allocation10] sm:$0xff] %v952_v25 }
 0x359   :  { %964 = dma.vmem_to_hbm [thread:$0]  %s960_s8, 128, %s962_s20, [#allocation4]  }
 0x35a   :  { %1380 = dma.done.wait [#allocation4], 128  }
 0x35b   :  { %1381 = vsyncadd [#allocation4], 4294967168 }
 0x35c   :  { %969 = vsyncpa [#allocation3], 1 }
 0x35d   :  { %970 = vsyncpa [#allocation6], 1 }
 0x35e   :  { %971 = vsyncpa [#allocation9], 1 }
 0x35f   :  { %972 = vsyncpa [#allocation4], 1 }

</bundles_post_ra>
